<compile_context>
chip_gen: v7x
topology: tpu7x:2x2x1
jax: 0.10.0
libtpu: 0.0.40
codegen_flags: <defaults>
</compile_context>

<pallas_src>
import jax
import jax.numpy as jnp
from jax.experimental import pallas as pl
from jax.experimental.pallas import tpu as pltpu

GROUP = 16  # tokens packed per grouped row -> GROUP*V = 384 output lanes (128-multiple)


def _round_up(x, m):
    return (x + m - 1) // m * m


def _block_diag(w, g):
    """(D, C) -> (g*D, g*C) block-diagonal with g copies of w."""
    D, C = w.shape
    eye = jnp.eye(g, dtype=w.dtype)
    return (eye[:, None, :, None] * w[None, :, None, :]).reshape(g * D, g * C)


def lang_mixer_kernel(army_ref, inst_ref, wa_ref, ba_ref, wi_ref, bi_ref, e_ref, out_ref):
    """Fused LangMixer tile in the grouped (lane-dense) layout.

    army_ref: (rows, G*A)   inst_ref: (rows, G*I)
    wa_ref  : (G*A, G*V+G) = [block_diag(army_v.W) | block_diag(army_k.W @ Q)]
    ba_ref  : (1,   G*V+G) matching bias row (f32)
    wi_ref/bi_ref: same for the inst branch.
    e_ref   : (G, G*V) 0/1 expansion matrix: row j is 1 on lanes [j*V, (j+1)*V).
    One MXU matmul per branch yields the V projection of every token in the group
    AND its attention logit (last G lanes) inside the same output tile.
    """
    GV = out_ref.shape[-1]                       # GROUP * V (lane dense)

    a = jnp.dot(army_ref[...], wa_ref[...],
                preferred_element_type=jnp.float32) + ba_ref[...]   # (rows, GV+G)
    b = jnp.dot(inst_ref[...], wi_ref[...],
                preferred_element_type=jnp.float32) + bi_ref[...]   # (rows, GV+G)

    av, s_a = a[:, :GV], a[:, GV:]               # lane-tile-aligned static slices
    iv, s_i = b[:, :GV], b[:, GV:]

    # 2-way softmax over [s_a, s_i] == sigmoid of the logit difference.
    p_a = 1.0 / (1.0 + jnp.exp(s_i - s_a))       # (rows, G), f32

    # Broadcast each token's gate over its V lanes with a tiny 0/1 matmul.
    pe = jnp.dot(p_a, e_ref[...], preferred_element_type=jnp.float32)  # (rows, GV)

    # av * p + iv * (1 - p)
    out_ref[...] = (iv + pe * (av - iv)).astype(out_ref.dtype)


def _choose_tile_m(M, tile_m, gran):
    m_ceil = _round_up(M, gran)
    tm = min(_round_up(max(tile_m, 1), gran), m_ceil)
    # Keep >= 2 grid steps when there is enough work so the "parallel" grid axis
    # can be sharded over v7x's two TensorCores.
    if m_ceil >= 2 * gran:
        tm = min(tm, _round_up(pl.cdiv(M, 2), gran))
    return max(tm, gran)


def lang_mixer(army_feat, inst_feat, params, *, tile_m=8192):
    """army_feat: (B, N, A), inst_feat: (B, N, I) -> (B, N, A+I)."""
    B, N, A = army_feat.shape
    I = inst_feat.shape[-1]
    V = A + I
    M = B * N
    G = GROUP
    act_dtype = army_feat.dtype

    # Fold Q into the K projections: (x @ Wk + bk) @ q == x @ (Wk @ q) + bk @ q,
    # then build grouped block-diagonal fused weights so each branch is one MXU
    # matmul producing (rows, G*V + G). Fold in f32 (exact), cast W to activation
    # dtype so bf16 inputs stay on the single-pass bf16 MXU path.
    f32 = jnp.float32
    wqa = params["wak"].astype(f32) @ params["q"].astype(f32)          # (A, 1)
    bqa = params["bak"].astype(f32) @ params["q"].astype(f32)          # (1, 1)
    wqi = params["wik"].astype(f32) @ params["q"].astype(f32)          # (I, 1)
    bqi = params["bik"].astype(f32) @ params["q"].astype(f32)          # (1, 1)

    wa = jnp.concatenate([_block_diag(params["wav"].astype(f32), G),
                          _block_diag(wqa, G)], axis=1).astype(act_dtype)   # (G*A, G*V+G)
    wi = jnp.concatenate([_block_diag(params["wiv"].astype(f32), G),
                          _block_diag(wqi, G)], axis=1).astype(act_dtype)   # (G*I, G*V+G)
    ba = jnp.concatenate([jnp.tile(params["bav"].astype(f32), (1, G)),
                          jnp.tile(bqa, (1, G))], axis=1)                   # (1, G*V+G) f32
    bi = jnp.concatenate([jnp.tile(params["biv"].astype(f32), (1, G)),
                          jnp.tile(bqi, (1, G))], axis=1)                   # (1, G*V+G) f32
    expand = _block_diag(jnp.ones((1, V), f32), G)                          # (G, G*V) 0/1

    # Row-tile sizing: large tiles amortize the ~0.35us per-grid-step overhead;
    # capped so grid_m >= 2 when possible (v7x dual TC) and so tiny problems do not
    # get a huge padded tile. Granularity = GROUP * sublane quantum of the dtype.
    sub = 16 if act_dtype == jnp.bfloat16 else 8
    gran = G * sub
    tile_m = _choose_tile_m(M, tile_m, gran)
    grid_m = pl.cdiv(M, tile_m)
    M_pad = grid_m * tile_m
    rows = tile_m // G

    army2d = army_feat.reshape(M, A)
    inst2d = inst_feat.reshape(M, I)
    if M_pad != M:
        army2d = jnp.pad(army2d, ((0, M_pad - M), (0, 0)))
        inst2d = jnp.pad(inst2d, ((0, M_pad - M), (0, 0)))
    # Grouped (lane-dense) views: row-major layout identities, free reshapes.
    army_g = army2d.reshape(M_pad // G, G * A)
    inst_g = inst2d.reshape(M_pad // G, G * I)

    def full_spec(shape):
        return pl.BlockSpec(shape, lambda i: (0, 0))

    out_g = pl.pallas_call(
        lang_mixer_kernel,
        out_shape=jax.ShapeDtypeStruct((M_pad // G, G * V), act_dtype),
        grid=(grid_m,),
        in_specs=[
            pl.BlockSpec((rows, G * A), lambda i: (i, 0)),    # army rows (lane dense)
            pl.BlockSpec((rows, G * I), lambda i: (i, 0)),    # inst rows (lane dense)
            full_spec((G * A, G * V + G)),                    # fused army W
            full_spec((1, G * V + G)),                        # fused army b
            full_spec((G * I, G * V + G)),                    # fused inst W
            full_spec((1, G * V + G)),                        # fused inst b
            full_spec((G, G * V)),                            # gate expansion matrix
        ],
        out_specs=pl.BlockSpec((rows, G * V), lambda i: (i, 0)),
        compiler_params=pltpu.CompilerParams(
            dimension_semantics=("parallel",),
            vmem_limit_bytes=32 * 1024 * 1024,   # explicit budget: safe on v5e/v6e/v7x
        ),
        # TODO(synk): if a v7x profile still shows exposed DMA, sweep
        # pipeline_mode=pl.Buffered(3) on the two row inputs and the output.
    )(army_g, inst_g, wa, ba, wi, bi, expand)

    # Free reshape back to token-major, drop padded tail rows.
    return out_g.reshape(M_pad, V)[:M].reshape(B, N, V)


def lang_mixer_ref(army_feat, inst_feat, params):
    """Pure-JAX reference mirroring the PyTorch forward."""
    ak = army_feat @ params["wak"] + params["bak"][0]
    av = army_feat @ params["wav"] + params["bav"][0]
    ik = inst_feat @ params["wik"] + params["bik"][0]
    iv = inst_feat @ params["wiv"] + params["biv"][0]
    qa = ak @ params["q"]                  # (B, N, 1)
    qi = ik @ params["q"]                  # (B, N, 1)
    score = jax.nn.softmax(jnp.concatenate([qa, qi], axis=2), axis=2)
    return av * score[:, :, 0, None] + iv * score[:, :, 1, None]


def init_params(key, army_dim, inst_dim, out_dim, dtype=jnp.float32):
    """Deterministic synthetic init (matches nn.Linear shapes; W stored transposed)."""
    V = army_dim + inst_dim
    ks = jax.random.split(key, 9)
    u = lambda k, shape, fan_in: jax.random.uniform(
        k, shape, dtype, -1.0 / jnp.sqrt(fan_in), 1.0 / jnp.sqrt(fan_in))
    return {
        "wak": u(ks[0], (army_dim, out_dim), army_dim),
        "bak": u(ks[1], (1, out_dim), army_dim),
        "wav": u(ks[2], (army_dim, V), army_dim),
        "bav": u(ks[3], (1, V), army_dim),
        "wik": u(ks[4], (inst_dim, out_dim), inst_dim),
        "bik": u(ks[5], (1, out_dim), inst_dim),
        "wiv": u(ks[6], (inst_dim, V), inst_dim),
        "biv": u(ks[7], (1, V), inst_dim),
        "q":   u(ks[8], (out_dim, 1), out_dim),
    }


if __name__ == "__main__":
    # TODO(synk): the PyTorch module also caches attn_score on `self.cache`;
    # that side-effect is not reproduced (only the forward output is returned).
    B, N = 2, 8
    army_dim, inst_dim, out_dim = 16, 8, 32

    key = jax.random.PRNGKey(0)
    k_army, k_inst, k_params = jax.random.split(key, 3)
    army_feat = jax.random.normal(k_army, (B, N, army_dim), jnp.float32)
    inst_feat = jax.random.normal(k_inst, (B, N, inst_dim), jnp.float32)
    params = init_params(k_params, army_dim, inst_dim, out_dim)

    out = jax.block_until_ready(lang_mixer(army_feat, inst_feat, params))
    ref = lang_mixer_ref(army_feat, inst_feat, params)
    assert out.shape == (B, N, army_dim + inst_dim)
    assert jnp.allclose(out, ref, atol=1e-4, rtol=1e-4), "mismatch vs reference"

    # Non-divisible M exercises the padded-tail path (padded tokens sharing a grouped
    # row with real tokens) at grid_m == 1.
    B2, N2 = 3, 5
    a2 = jax.random.normal(jax.random.PRNGKey(1), (B2, N2, army_dim), jnp.float32)
    i2 = jax.random.normal(jax.random.PRNGKey(2), (B2, N2, inst_dim), jnp.float32)
    out2 = jax.block_until_ready(lang_mixer(a2, i2, params, tile_m=8))
    ref2 = lang_mixer_ref(a2, i2, params)
    assert out2.shape == (B2, N2, army_dim + inst_dim)
    assert jnp.allclose(out2, ref2, atol=1e-4, rtol=1e-4), "mismatch vs reference (padded)"

    # Multi-step grid (grid_m == 2) + padded tail — exercises the "parallel" axis that
    # v7x shards across its two TensorCores.
    B3, N3 = 4, 40
    a3 = jax.random.normal(jax.random.PRNGKey(3), (B3, N3, army_dim), jnp.float32)
    i3 = jax.random.normal(jax.random.PRNGKey(4), (B3, N3, inst_dim), jnp.float32)
    out3 = jax.block_until_ready(lang_mixer(a3, i3, params, tile_m=128))
    ref3 = lang_mixer_ref(a3, i3, params)
    assert out3.shape == (B3, N3, army_dim + inst_dim)
    assert jnp.allclose(out3, ref3, atol=1e-4, rtol=1e-4), "mismatch vs reference (grid=2)"

    print("KERNEL_OK")
</pallas_src>

<mosaic_0001>
module attributes {stable_mosaic.version = 11 : i64} {
  func.func @lang_mixer_kernel(%arg0: i32, %arg1: memref<8x256xf32, #tpu.memory_space<vmem>>, %arg2: memref<8x128xf32, #tpu.memory_space<vmem>>, %arg3: memref<256x400xf32, #tpu.memory_space<vmem>>, %arg4: memref<1x400xf32, #tpu.memory_space<vmem>>, %arg5: memref<128x400xf32, #tpu.memory_space<vmem>>, %arg6: memref<1x400xf32, #tpu.memory_space<vmem>>, %arg7: memref<16x384xf32, #tpu.memory_space<vmem>>, %arg8: memref<8x384xf32, #tpu.memory_space<vmem>>) attributes {dimension_semantics = [#tpu.dimension_semantics<parallel>], iteration_bounds = array<i64: 1>, scalar_prefetch = 0 : i64, scratch_operands = 0 : i64, tpu.core_type = #tpu.core_type<tc>, window_params = [{transform_indices = @transform_0, window_bounds = array<i64: 8, 256>}, {transform_indices = @transform_1, window_bounds = array<i64: 8, 128>}, {pipeline_mode = #tpu.pipeline_mode<synchronous>, transform_indices = @transform_2, window_bounds = array<i64: 256, 400>}, {pipeline_mode = #tpu.pipeline_mode<synchronous>, transform_indices = @transform_3, window_bounds = array<i64: 1, 400>}, {pipeline_mode = #tpu.pipeline_mode<synchronous>, transform_indices = @transform_4, window_bounds = array<i64: 128, 400>}, {pipeline_mode = #tpu.pipeline_mode<synchronous>, transform_indices = @transform_5, window_bounds = array<i64: 1, 400>}, {pipeline_mode = #tpu.pipeline_mode<synchronous>, transform_indices = @transform_6, window_bounds = array<i64: 16, 384>}, {transform_indices = @transform_7, window_bounds = array<i64: 8, 384>}]} {
    %c0 = arith.constant 0 : index
    %c0_0 = arith.constant 0 : index
    %0 = vector.load %arg1[%c0, %c0_0] : memref<8x256xf32, #tpu.memory_space<vmem>>, vector<8x256xf32>
    %c0_1 = arith.constant 0 : index
    %c0_2 = arith.constant 0 : index
    %1 = vector.load %arg3[%c0_1, %c0_2] : memref<256x400xf32, #tpu.memory_space<vmem>>, vector<256x400xf32>
    %cst = arith.constant dense<0.000000e+00> : vector<8x400xf32>
    %2 = tpu.matmul %0, %1, %cst {dimension_numbers = #tpu.dot_dimension_numbers<[1], [0], [0], [1], [0, 0, 1, 1], [], []>} : vector<8x256xf32>, vector<256x400xf32>, vector<8x400xf32> -> vector<8x400xf32>
    %c0_3 = arith.constant 0 : index
    %c0_4 = arith.constant 0 : index
    %3 = vector.load %arg4[%c0_3, %c0_4] : memref<1x400xf32, #tpu.memory_space<vmem>>, vector<1x400xf32>
    %4 = vector.broadcast %3 : vector<1x400xf32> to vector<8x400xf32>
    %5 = arith.addf %2, %4 : vector<8x400xf32>
    %c0_5 = arith.constant 0 : index
    %c0_6 = arith.constant 0 : index
    %6 = vector.load %arg2[%c0_5, %c0_6] : memref<8x128xf32, #tpu.memory_space<vmem>>, vector<8x128xf32>
    %c0_7 = arith.constant 0 : index
    %c0_8 = arith.constant 0 : index
    %7 = vector.load %arg5[%c0_7, %c0_8] : memref<128x400xf32, #tpu.memory_space<vmem>>, vector<128x400xf32>
    %cst_9 = arith.constant dense<0.000000e+00> : vector<8x400xf32>
    %8 = tpu.matmul %6, %7, %cst_9 {dimension_numbers = #tpu.dot_dimension_numbers<[1], [0], [0], [1], [0, 0, 1, 1], [], []>} : vector<8x128xf32>, vector<128x400xf32>, vector<8x400xf32> -> vector<8x400xf32>
    %c0_10 = arith.constant 0 : index
    %c0_11 = arith.constant 0 : index
    %9 = vector.load %arg6[%c0_10, %c0_11] : memref<1x400xf32, #tpu.memory_space<vmem>>, vector<1x400xf32>
    %10 = vector.broadcast %9 : vector<1x400xf32> to vector<8x400xf32>
    %11 = arith.addf %8, %10 : vector<8x400xf32>
    %12 = vector.extract_strided_slice %5 {offsets = [0, 0], sizes = [8, 384], strides = [1, 1]} : vector<8x400xf32> to vector<8x384xf32>
    %13 = vector.extract_strided_slice %5 {offsets = [0, 384], sizes = [8, 16], strides = [1, 1]} : vector<8x400xf32> to vector<8x16xf32>
    %14 = vector.extract_strided_slice %11 {offsets = [0, 0], sizes = [8, 384], strides = [1, 1]} : vector<8x400xf32> to vector<8x384xf32>
    %15 = vector.extract_strided_slice %11 {offsets = [0, 384], sizes = [8, 16], strides = [1, 1]} : vector<8x400xf32> to vector<8x16xf32>
    %16 = arith.subf %15, %13 : vector<8x16xf32>
    %17 = math.exp %16 : vector<8x16xf32>
    %cst_12 = arith.constant 1.000000e+00 : f32
    %18 = vector.broadcast %cst_12 : f32 to vector<8x16xf32>
    %19 = arith.addf %18, %17 : vector<8x16xf32>
    %cst_13 = arith.constant 1.000000e+00 : f32
    %20 = vector.broadcast %cst_13 : f32 to vector<8x16xf32>
    %21 = arith.divf %20, %19 : vector<8x16xf32>
    %c0_14 = arith.constant 0 : index
    %c0_15 = arith.constant 0 : index
    %22 = vector.load %arg7[%c0_14, %c0_15] : memref<16x384xf32, #tpu.memory_space<vmem>>, vector<16x384xf32>
    %cst_16 = arith.constant dense<0.000000e+00> : vector<8x384xf32>
    %23 = tpu.matmul %21, %22, %cst_16 {dimension_numbers = #tpu.dot_dimension_numbers<[1], [0], [0], [1], [0, 0, 1, 1], [], []>} : vector<8x16xf32>, vector<16x384xf32>, vector<8x384xf32> -> vector<8x384xf32>
    %24 = arith.subf %12, %14 : vector<8x384xf32>
    %25 = arith.mulf %23, %24 : vector<8x384xf32>
    %26 = arith.addf %14, %25 : vector<8x384xf32>
    %c0_17 = arith.constant 0 : index
    %c0_18 = arith.constant 0 : index
    %27 = vector.load %arg8[%c0_17, %c0_18] : memref<8x384xf32, #tpu.memory_space<vmem>>, vector<8x384xf32>
    tpu.vector_store %arg8[%c0_17, %c0_18], %26 {strides = array<i32>} : memref<8x384xf32, #tpu.memory_space<vmem>>, vector<8x384xf32>,
    return
  }
  func.func @transform_0(%arg0: i32) -> (i32, i32) {
    %c0_i32 = arith.constant 0 : i32
    %c0_i32_0 = arith.constant 0 : i32
    return %arg0, %c0_i32 : i32, i32
  }
  func.func @transform_1(%arg0: i32) -> (i32, i32) {
    %c0_i32 = arith.constant 0 : i32
    %c0_i32_0 = arith.constant 0 : i32
    return %arg0, %c0_i32 : i32, i32
  }
  func.func @transform_2(%arg0: i32) -> (i32, i32) {
    %c0_i32 = arith.constant 0 : i32
    %c0_i32_0 = arith.constant 0 : i32
    %c0_i32_1 = arith.constant 0 : i32
    return %c0_i32, %c0_i32_0 : i32, i32
  }
  func.func @transform_3(%arg0: i32) -> (i32, i32) {
    %c0_i32 = arith.constant 0 : i32
    %c0_i32_0 = arith.constant 0 : i32
    %c0_i32_1 = arith.constant 0 : i32
    return %c0_i32, %c0_i32_0 : i32, i32
  }
  func.func @transform_4(%arg0: i32) -> (i32, i32) {
    %c0_i32 = arith.constant 0 : i32
    %c0_i32_0 = arith.constant 0 : i32
    %c0_i32_1 = arith.constant 0 : i32
    return %c0_i32, %c0_i32_0 : i32, i32
  }
  func.func @transform_5(%arg0: i32) -> (i32, i32) {
    %c0_i32 = arith.constant 0 : i32
    %c0_i32_0 = arith.constant 0 : i32
    %c0_i32_1 = arith.constant 0 : i32
    return %c0_i32, %c0_i32_0 : i32, i32
  }
  func.func @transform_6(%arg0: i32) -> (i32, i32) {
    %c0_i32 = arith.constant 0 : i32
    %c0_i32_0 = arith.constant 0 : i32
    %c0_i32_1 = arith.constant 0 : i32
    return %c0_i32, %c0_i32_0 : i32, i32
  }
  func.func @transform_7(%arg0: i32) -> (i32, i32) {
    %c0_i32 = arith.constant 0 : i32
    %c0_i32_0 = arith.constant 0 : i32
    return %arg0, %c0_i32 : i32, i32
  }
}

</mosaic_0001>

<bundles_post_ra>
// kernel: tpu_custom_call.1
= control target key start
LH: loop header
LB: loop body
LE: loop exit
PB: predicated region body
PF: predicated region fallthrough
CT: control target
= control target key end

     0   :  { %s1649_s0 = inlined_call_operand.vmem [shape: f32[8,256], index: 0, kind: input, shape index: {}]   ;;  %s1650_s1 = inlined_call_operand.vmem [shape: f32[8,128], index: 1, kind: input, shape index: {}]   ;;  %s1651_s2 = inlined_call_operand.vmem [shape: f32[256,400], index: 2, kind: input, shape index: {}]   ;;  %s1652_s3 = inlined_call_operand.vmem [shape: f32[1,400], index: 3, kind: input, shape index: {}]   ;;  %s1653_s4 = inlined_call_operand.vmem [shape: f32[128,400], index: 4, kind: input, shape index: {}]   ;;  %s1654_s5 = inlined_call_operand.vmem [shape: f32[1,400], index: 5, kind: input, shape index: {}]   ;;  %s1655_s6 = inlined_call_operand.vmem [shape: f32[16,384], index: 6, kind: input, shape index: {}]   ;;  %s1656_s7 = inlined_call_operand.hbm [shape: f32[8,384], index: 7, kind: output, shape index: {}]  }
   0x1   :  { %v32_v0 = vld [vmem:[%s1651_s2 + $0x18] sm:$0xff]  ;;  %v31_v2 = vld [vmem:[%s1651_s2 + $0x10] sm:$0xff]  ;;  %v28_v41 = vld [vmem:[%s1649_s0 + $0x8] sm:$0xff] }
   0x2   :  { %v36_v1 = vld [vmem:[%s1651_s2 + $0x38] sm:$0xff]  ;;  %v35_v4 = vld [vmem:[%s1651_s2 + $0x30] sm:$0xff]  ;;  %314 = vmatprep.mubr.f32.mxu1 %v28_v41  ;;  %243 = vmatprep.mubr.f32.mxu0 %v28_v41  ;;  %v30_v62 = vld [vmem:[%s1651_s2 + $0x8] sm:$0xff] }
   0x3   :  { %v809_v3 = vpack.c.bf16 %v36_v1, %v32_v0  ;;  %v40_v5 = vld [vmem:[%s1651_s2 + $0x58] sm:$0xff]  ;;  %v811_v7 = vpack.c.bf16 %v35_v4, %v31_v2  ;;  %v39_v9 = vld [vmem:[%s1651_s2 + $0x50] sm:$0xff]  ;;  %v34_v63 = vld [vmem:[%s1651_s2 + $0x28] sm:$0xff] }
   0x4   :  { %v44_v6 = vld [vmem:[%s1651_s2 + $0x78] sm:$0xff]  ;;  %v43_v10 = vld [vmem:[%s1651_s2 + $0x70] sm:$0xff]  ;;  %v29_v0 = vld [vmem:[%s1651_s2] sm:$0xff]  ;;  %v745_v1 = vpack.c.bf16 %v34_v63, %v30_v62 }
   0x5   :  { %v813_v8 = vpack.c.bf16 %v44_v6, %v40_v5  ;;  %v48_v11 = vld [vmem:[%s1651_s2 + $0x98] sm:$0xff]  ;;  %810 = vmatprep.subr.bf16.mxu1 %v809_v3  ;;  %v815_v13 = vpack.c.bf16 %v43_v10, %v39_v9  ;;  %v47_v15 = vld [vmem:[%s1651_s2 + $0x90] sm:$0xff]  ;;  %v33_v2 = vld [vmem:[%s1651_s2 + $0x20] sm:$0xff] }
   0x6   :  { %v52_v12 = vld [vmem:[%s1651_s2 + $0xb8] sm:$0xff]  ;;  %812 = vmatpush1.bf16.msra.mxu1 %v811_v7  ;;  %v51_v16 = vld [vmem:[%s1651_s2 + $0xb0] sm:$0xff]  ;;  %v38_v3 = vld [vmem:[%s1651_s2 + $0x48] sm:$0xff]  ;;  %v747_v5 = vpack.c.bf16 %v33_v2, %v29_v0  ;;  %746 = vmatprep.subr.bf16.mxu0 %v745_v1 }
   0x7   :  { %814 = vmatprep.subr.bf16.mxu1 %v813_v8  ;;  %v817_v14 = vpack.c.bf16 %v52_v12, %v48_v11  ;;  %v56_v17 = vld [vmem:[%s1651_s2 + $0xd8] sm:$0xff]  ;;  %v819_v19 = vpack.c.bf16 %v51_v16, %v47_v15  ;;  %v55_v21 = vld [vmem:[%s1651_s2 + $0xd0] sm:$0xff]  ;;  %v42_v4 = vld [vmem:[%s1651_s2 + $0x68] sm:$0xff] }
   0x8   :  { %v60_v18 = vld [vmem:[%s1651_s2 + $0xf8] sm:$0xff]  ;;  %v59_v22 = vld [vmem:[%s1651_s2 + $0xf0] sm:$0xff]  ;;  %v749_v6 = vpack.c.bf16 %v42_v4, %v38_v3  ;;  %v37_v7 = vld [vmem:[%s1651_s2 + $0x40] sm:$0xff]  ;;  %748 = vmatpush1.bf16.msra.mxu0 %v747_v5 }
   0x9   :  { %v821_v20 = vpack.c.bf16 %v60_v18, %v56_v17  ;;  %v64_v23 = vld [vmem:[%s1651_s2 + $0x118] sm:$0xff]  ;;  %v823_v25 = vpack.c.bf16 %v59_v22, %v55_v21  ;;  %v63_v27 = vld [vmem:[%s1651_s2 + $0x110] sm:$0xff]  ;;  %v41_v8 = vld [vmem:[%s1651_s2 + $0x60] sm:$0xff] }
   0xa   :  { %816 = vmatpush1.bf16.msra.mxu1 %v815_v13  ;;  %v68_v24 = vld [vmem:[%s1651_s2 + $0x138] sm:$0xff]  ;;  %v67_v28 = vld [vmem:[%s1651_s2 + $0x130] sm:$0xff]  ;;  %v46_v9 = vld [vmem:[%s1651_s2 + $0x88] sm:$0xff]  ;;  %v751_v16 = vpack.c.bf16 %v41_v8, %v37_v7  ;;  %750 = vmatprep.subr.bf16.mxu0 %v749_v6 }
   0xb   :  { %818 = vmatprep.subr.bf16.mxu1 %v817_v14  ;;  %v825_v26 = vpack.c.bf16 %v68_v24, %v64_v23  ;;  %v72_v29 = vld [vmem:[%s1651_s2 + $0x158] sm:$0xff]  ;;  %v827_v31 = vpack.c.bf16 %v67_v28, %v63_v27  ;;  %v71_v33 = vld [vmem:[%s1651_s2 + $0x150] sm:$0xff]  ;;  %v50_v11 = vld [vmem:[%s1651_s2 + $0xa8] sm:$0xff] }
   0xc   :  { %v76_v30 = vld [vmem:[%s1651_s2 + $0x178] sm:$0xff]  ;;  %v75_v34 = vld [vmem:[%s1651_s2 + $0x170] sm:$0xff]  ;;  %v753_v18 = vpack.c.bf16 %v50_v11, %v46_v9  ;;  %v54_v21 = vld [vmem:[%s1651_s2 + $0xc8] sm:$0xff]  ;;  %752 = vmatpush1.bf16.msra.mxu0 %v751_v16 }
   0xd   :  { %v829_v32 = vpack.c.bf16 %v76_v30, %v72_v29  ;;  %v80_v35 = vld [vmem:[%s1651_s2 + $0x198] sm:$0xff]  ;;  %v831_v37 = vpack.c.bf16 %v75_v34, %v71_v33  ;;  %v79_v39 = vld [vmem:[%s1651_s2 + $0x190] sm:$0xff]  ;;  %v58_v22 = vld [vmem:[%s1651_s2 + $0xe8] sm:$0xff] }
   0xe   :  { %820 = vmatpush1.bf16.msra.mxu1 %v819_v19  ;;  %v84_v36 = vld [vmem:[%s1651_s2 + $0x1b8] sm:$0xff]  ;;  %v83_v40 = vld [vmem:[%s1651_s2 + $0x1b0] sm:$0xff]  ;;  %v45_v19 = vld [vmem:[%s1651_s2 + $0x80] sm:$0xff]  ;;  %754 = vmatprep.subr.bf16.mxu0 %v753_v18  ;;  %v757_v30 = vpack.c.bf16 %v58_v22, %v54_v21 }
   0xf   :  { %822 = vmatprep.subr.bf16.mxu1 %v821_v20  ;;  %v833_v38 = vpack.c.bf16 %v84_v36, %v80_v35  ;;  %v88_v42 = vld [vmem:[%s1651_s2 + $0x1d8] sm:$0xff]  ;;  %v835_v44 = vpack.c.bf16 %v83_v40, %v79_v39  ;;  %v87_v46 = vld [vmem:[%s1651_s2 + $0x1d0] sm:$0xff]  ;;  %v49_v20 = vld [vmem:[%s1651_s2 + $0xa0] sm:$0xff] }
  0x10   :  { %v92_v43 = vld [vmem:[%s1651_s2 + $0x1f8] sm:$0xff]  ;;  %v91_v47 = vld [vmem:[%s1651_s2 + $0x1f0] sm:$0xff]  ;;  %v755_v28 = vpack.c.bf16 %v49_v20, %v45_v19  ;;  %v62_v33 = vld [vmem:[%s1651_s2 + $0x108] sm:$0xff] }
  0x11   :  { %v837_v45 = vpack.c.bf16 %v92_v43, %v88_v42  ;;  %v96_v48 = vld [vmem:[%s1651_s2 + $0x218] sm:$0xff]  ;;  %v839_v50 = vpack.c.bf16 %v91_v47, %v87_v46  ;;  %v95_v52 = vld [vmem:[%s1651_s2 + $0x210] sm:$0xff]  ;;  %v66_v34 = vld [vmem:[%s1651_s2 + $0x128] sm:$0xff] }
  0x12   :  { %824 = vmatpush1.bf16.msra.mxu1 %v823_v25  ;;  %v100_v49 = vld [vmem:[%s1651_s2 + $0x238] sm:$0xff]  ;;  %v99_v53 = vld [vmem:[%s1651_s2 + $0x230] sm:$0xff]  ;;  %756 = vmatpush1.bf16.msra.mxu0 %v755_v28  ;;  %v761_v42 = vpack.c.bf16 %v66_v34, %v62_v33  ;;  %v61_v43 = vld [vmem:[%s1651_s2 + $0x100] sm:$0xff] }
  0x13   :  { %826 = vmatprep.subr.bf16.mxu1 %v825_v26  ;;  %v841_v51 = vpack.c.bf16 %v100_v49, %v96_v48  ;;  %v104_v54 = vld [vmem:[%s1651_s2 + $0x258] sm:$0xff]  ;;  %v103_v56 = vld [vmem:[%s1651_s2 + $0x250] sm:$0xff]  ;;  %v843_v57 = vpack.c.bf16 %v99_v53, %v95_v52  ;;  %758 = vmatprep.subr.bf16.mxu0 %v757_v30  ;;  %v74_v46 = vld [vmem:[%s1651_s2 + $0x168] sm:$0xff] }
  0x14   :  { %v108_v55 = vld [vmem:[%s1651_s2 + $0x278] sm:$0xff]  ;;  %v107_v58 = vld [vmem:[%s1651_s2 + $0x270] sm:$0xff]  ;;  %v77_v3 = vld [vmem:[%s1651_s2 + $0x180] sm:$0xff] }
  0x15   :  { %v112_v59 = vld [vmem:[%s1651_s2 + $0x298] sm:$0xff]  ;;  %v845_v61 = vpack.c.bf16 %v108_v55, %v104_v54  ;;  %v847_v10 = vpack.c.bf16 %v107_v58, %v103_v56  ;;  %v111_v13 = vld [vmem:[%s1651_s2 + $0x290] sm:$0xff]  ;;  %v69_v55 = vld [vmem:[%s1651_s2 + $0x140] sm:$0xff] }
  0x16   :  { %828 = vmatpush1.bf16.msra.mxu1 %v827_v31  ;;  %v116_v60 = vld [vmem:[%s1651_s2 + $0x2b8] sm:$0xff]  ;;  %v115_v14 = vld [vmem:[%s1651_s2 + $0x2b0] sm:$0xff]  ;;  %v53_v31 = vld [vmem:[%s1651_s2 + $0xc0] sm:$0xff] }
  0x17   :  { %830 = vmatprep.subr.bf16.mxu1 %v829_v32  ;;  %v849_v12 = vpack.c.bf16 %v116_v60, %v112_v59  ;;  %v120_v15 = vld [vmem:[%s1651_s2 + $0x2d8] sm:$0xff]  ;;  %v851_v23 = vpack.c.bf16 %v115_v14, %v111_v13  ;;  %v119_v25 = vld [vmem:[%s1651_s2 + $0x2d0] sm:$0xff]  ;;  %v57_v32 = vld [vmem:[%s1651_s2 + $0xe0] sm:$0xff] }
  0x18   :  { %v124_v17 = vld [vmem:[%s1651_s2 + $0x2f8] sm:$0xff]  ;;  %v123_v26 = vld [vmem:[%s1651_s2 + $0x2f0] sm:$0xff]  ;;  %v759_v40 = vpack.c.bf16 %v57_v32, %v53_v31  ;;  %v73_v56 = vld [vmem:[%s1651_s2 + $0x160] sm:$0xff] }
  0x19   :  { %v853_v24 = vpack.c.bf16 %v124_v17, %v120_v15  ;;  %v128_v27 = vld [vmem:[%s1651_s2 + $0x318] sm:$0xff]  ;;  %v855_v35 = vpack.c.bf16 %v123_v26, %v119_v25  ;;  %v135_v49 = vld [vmem:[%s1651_s2 + $0x350] sm:$0xff]  ;;  %v82_v58 = vld [vmem:[%s1651_s2 + $0x1a8] sm:$0xff]  ;;  %v767_v0 = vpack.c.bf16 %v73_v56, %v69_v55 }
  0x1a   :  { %832 = vmatpush1.bf16.msra.mxu1 %v831_v37  ;;  %v132_v29 = vld [vmem:[%s1651_s2 + $0x338] sm:$0xff]  ;;  %v127_v37 = vld [vmem:[%s1651_s2 + $0x310] sm:$0xff]  ;;  %760 = vmatpush1.bf16.msra.mxu0 %v759_v40  ;;  %v81_v4 = vld [vmem:[%s1651_s2 + $0x1a0] sm:$0xff] }
  0x1b   :  { %834 = vmatprep.subr.bf16.mxu1 %v833_v38  ;;  %v857_v36 = vpack.c.bf16 %v132_v29, %v128_v27  ;;  %v131_v38 = vld [vmem:[%s1651_s2 + $0x330] sm:$0xff]  ;;  %v136_v39 = vld [vmem:[%s1651_s2 + $0x358] sm:$0xff]  ;;  %762 = vmatprep.subr.bf16.mxu0 %v761_v42  ;;  %v86_v5 = vld [vmem:[%s1651_s2 + $0x1c8] sm:$0xff] }
  0x1c   :  { %v140_v41 = vld [vmem:[%s1651_s2 + $0x378] sm:$0xff]  ;;  %v859_v47 = vpack.c.bf16 %v131_v38, %v127_v37  ;;  %v147_v62 = vld [vmem:[%s1651_s2 + $0x3b0] sm:$0xff]  ;;  %v90_v6 = vld [vmem:[%s1651_s2 + $0x1e8] sm:$0xff] }
  0x1d   :  { %v861_v48 = vpack.c.bf16 %v140_v41, %v136_v39  ;;  %v148_v53 = vld [vmem:[%s1651_s2 + $0x3b8] sm:$0xff] }
  0x1e   :  { %836 = vmatpush1.bf16.msra.mxu1 %v835_v44  ;;  %v65_v44 = vld [vmem:[%s1651_s2 + $0x120] sm:$0xff]  ;;  %v152_v63 = vld [vmem:[%s1651_s2 + $0x3d8] sm:$0xff] }
  0x1f   :  { %838 = vmatprep.subr.bf16.mxu1 %v837_v45  ;;  %v70_v45 = vld [vmem:[%s1651_s2 + $0x148] sm:$0xff]  ;;  %v763_v52 = vpack.c.bf16 %v65_v44, %v61_v43  ;;  %v156_v1 = vld [vmem:[%s1651_s2 + $0x3f8] sm:$0xff] }
  0x20   :  { %v765_v54 = vpack.c.bf16 %v74_v46, %v70_v45 }
  0x21   :  { %764 = vmatpush1.bf16.msra.mxu0 %v763_v52 }
  0x22   :  { %840 = vmatpush1.bf16.msra.mxu1 %v839_v50  ;;  %v139_v50 = vld [vmem:[%s1651_s2 + $0x370] sm:$0xff]  ;;  %766 = vmatprep.subr.bf16.mxu0 %v765_v54 }
  0x23   :  { %842 = vmatprep.subr.bf16.mxu1 %v841_v51  ;;  %v144_v51 = vld [vmem:[%s1651_s2 + $0x398] sm:$0xff]  ;;  %v863_v59 = vpack.c.bf16 %v139_v50, %v135_v49 }
  0x24   :  { %v865_v60 = vpack.c.bf16 %v148_v53, %v144_v51 }
  0x26   :  { %844 = vmatpush1.bf16.msra.mxu1 %v843_v57  ;;  %v78_v57 = vld [vmem:[%s1651_s2 + $0x188] sm:$0xff] }
  0x27   :  { %846 = vmatprep.subr.bf16.mxu1 %v845_v61  ;;  %v143_v61 = vld [vmem:[%s1651_s2 + $0x390] sm:$0xff]  ;;  %v769_v2 = vpack.c.bf16 %v82_v58, %v78_v57 }
  0x28   :  { %v867_v7 = vpack.c.bf16 %v147_v62, %v143_v61 }
  0x2a   :  { %848 = vmatpush1.bf16.msra.mxu1 %v847_v10 }
  0x2b   :  { %850 = vmatprep.subr.bf16.mxu1 %v849_v12 }
  0x2e   :  { %852 = vmatpush1.bf16.msra.mxu1 %v851_v23 }
  0x2f   :  { %854 = vmatprep.subr.bf16.mxu1 %v853_v24 }
  0x32   :  { %856 = vmatpush1.bf16.msra.mxu1 %v855_v35 }
  0x33   :  { %858 = vmatprep.subr.bf16.mxu1 %v857_v36 }
  0x36   :  { %860 = vmatpush1.bf16.msra.mxu1 %v859_v47 }
  0x37   :  { %862 = vmatprep.subr.bf16.mxu1 %v861_v48 }
  0x3a   :  { %864 = vmatpush1.bf16.msra.mxu1 %v863_v59 }
  0x3b   :  { %12 = vsyncpa [#allocation3], 0  ;;  %866 = vmatprep.subr.bf16.mxu1 %v865_v60  ;;  %v869_v8 = vpack.c.bf16 %v156_v1, %v152_v63  ;;  %v151_v9 = vld [vmem:[%s1651_s2 + $0x3d0] sm:$0xff]  ;;  %v325_v11 = vld [vmem:[%s1653_s4 + $0x18] sm:$0xff]  ;;  %768 = vmatpush1.bf16.msra.mxu0 %v767_v0  ;;  %v771_v12 = vpack.c.bf16 %v81_v4, %v77_v3  ;;  %v773_v14 = vpack.c.bf16 %v90_v6, %v86_v5  ;;  %v976_v45 = vmov 0.0  }
  0x3c   :  { %v155_v10 = vld [vmem:[%s1651_s2 + $0x3f0] sm:$0xff]  ;;  %v329_v13 = vld [vmem:[%s1653_s4 + $0x38] sm:$0xff]  ;;  %770 = vmatprep.subr.bf16.mxu0 %v769_v2  ;;  %v85_v15 = vld [vmem:[%s1651_s2 + $0x1c0] sm:$0xff]  ;;  %vm978_vm0 = vmmov 0   ;;  %vm562_vm1 = vcmask 130048  }
  0x3d   :  { %v89_v16 = vld [vmem:[%s1651_s2 + $0x1e0] sm:$0xff]  ;;  %v94_v17 = vld [vmem:[%s1651_s2 + $0x208] sm:$0xff]  ;;  %v871_v19 = vpack.c.bf16 %v155_v10, %v151_v9  ;;  %v905_v20 = vpack.c.bf16 %v329_v13, %v325_v11  ;;  %v324_v21 = vld [vmem:[%s1653_s4 + $0x10] sm:$0xff] }
  0x3e   :  { %v98_v18 = vld [vmem:[%s1651_s2 + $0x228] sm:$0xff]  ;;  %868 = vmatpush1.bf16.msra.mxu1 %v867_v7  ;;  %v328_v22 = vld [vmem:[%s1653_s4 + $0x30] sm:$0xff]  ;;  %v333_v23 = vld [vmem:[%s1653_s4 + $0x58] sm:$0xff]  ;;  %v775_v24 = vpack.c.bf16 %v89_v16, %v85_v15 }
  0x3f   :  { %870 = vmatprep.subr.bf16.mxu1 %v869_v8  ;;  %772 = vmatpush1.bf16.msra.mxu0 %v771_v12  ;;  %v337_v25 = vld [vmem:[%s1653_s4 + $0x78] sm:$0xff]  ;;  %v777_v26 = vpack.c.bf16 %v98_v18, %v94_v17  ;;  %v93_v27 = vld [vmem:[%s1651_s2 + $0x200] sm:$0xff]  ;;  %v102_v29 = vld [vmem:[%s1651_s2 + $0x248] sm:$0xff]  ;;  %v907_v32 = vpack.c.bf16 %v328_v22, %v324_v21 }
  0x40   :  { %774 = vmatprep.subr.bf16.mxu0 %v773_v14  ;;  %v97_v28 = vld [vmem:[%s1651_s2 + $0x220] sm:$0xff]  ;;  %v106_v30 = vld [vmem:[%s1651_s2 + $0x268] sm:$0xff]  ;;  %v909_v33 = vpack.c.bf16 %v337_v25, %v333_v23  ;;  %v332_v34 = vld [vmem:[%s1653_s4 + $0x50] sm:$0xff] }
  0x41   :  { %v1350_v31 = vld [vmem:[%s1649_s0] sm:$0xff]  ;;  %v336_v35 = vld [vmem:[%s1653_s4 + $0x70] sm:$0xff]  ;;  %v341_v36 = vld [vmem:[%s1653_s4 + $0x98] sm:$0xff]  ;;  %v779_v37 = vpack.c.bf16 %v97_v28, %v93_v27  ;;  %v781_v39 = vpack.c.bf16 %v106_v30, %v102_v29 }
  0x42   :  { %872 = vmatpush1.bf16.msra.mxu1 %v871_v19  ;;  %v345_v38 = vld [vmem:[%s1653_s4 + $0xb8] sm:$0xff]  ;;  %v101_v40 = vld [vmem:[%s1651_s2 + $0x240] sm:$0xff]  ;;  %v110_v42 = vld [vmem:[%s1651_s2 + $0x288] sm:$0xff]  ;;  %v911_v44 = vpack.c.bf16 %v336_v35, %v332_v34 }
  0x43   :  { %906 = vmatprep.subr.bf16.mxu1 %v905_v20  ;;  %776 = vmatpush1.bf16.msra.mxu0 %v775_v24  ;;  %v105_v41 = vld [vmem:[%s1651_s2 + $0x260] sm:$0xff]  ;;  %v114_v43 = vld [vmem:[%s1651_s2 + $0x2a8] sm:$0xff]  ;;  %v913_v46 = vpack.c.bf16 %v345_v38, %v341_v36  ;;  %v340_v47 = vld [vmem:[%s1653_s4 + $0x90] sm:$0xff] }
  0x44   :  { %778 = vmatprep.subr.bf16.mxu0 %v777_v26  ;;  %v344_v48 = vld [vmem:[%s1653_s4 + $0xb0] sm:$0xff]  ;;  %v349_v49 = vld [vmem:[%s1653_s4 + $0xd8] sm:$0xff]  ;;  %v783_v50 = vpack.c.bf16 %v105_v41, %v101_v40  ;;  %v785_v52 = vpack.c.bf16 %v114_v43, %v110_v42  ;;  %v109_v53 = vld [vmem:[%s1651_s2 + $0x280] sm:$0xff] }
  0x45   :  { %315 = vmatmul.mubr.f32.vlgmr.msra.gmra.mrb[0].mxu1 %v1350_v31  ;;  %v353_v51 = vld [vmem:[%s1653_s4 + $0xf8] sm:$0xff]  ;;  %v113_v54 = vld [vmem:[%s1651_s2 + $0x2a0] sm:$0xff]  ;;  %v118_v55 = vld [vmem:[%s1651_s2 + $0x2c8] sm:$0xff]  ;;  %v915_v57 = vpack.c.bf16 %v344_v48, %v340_v47 }
  0x46   :  { %908 = vmatpush1.bf16.msra.mxu1 %v907_v32  ;;  %543 = vmatprep.mubr.f32.mxu1 %v976_v45  ;;  %v122_v56 = vld [vmem:[%s1651_s2 + $0x2e8] sm:$0xff]  ;;  %v917_v58 = vpack.c.bf16 %v353_v51, %v349_v49  ;;  %v348_v59 = vld [vmem:[%s1653_s4 + $0xd0] sm:$0xff]  ;;  %v357_v61 = vld [vmem:[%s1653_s4 + $0x118] sm:$0xff]  ;;  %v787_v62 = vpack.c.bf16 %v113_v54, %v109_v53 }
  0x47   :  { %910 = vmatprep.subr.bf16.mxu1 %v909_v33  ;;  %780 = vmatpush1.bf16.msra.mxu0 %v779_v37  ;;  %v352_v60 = vld [vmem:[%s1653_s4 + $0xf0] sm:$0xff]  ;;  %v361_v63 = vld [vmem:[%s1653_s4 + $0x138] sm:$0xff]  ;;  %v789_v0 = vpack.c.bf16 %v122_v56, %v118_v55  ;;  %v117_v1 = vld [vmem:[%s1651_s2 + $0x2c0] sm:$0xff] }
  0x48   :  { %782 = vmatprep.subr.bf16.mxu0 %v781_v39  ;;  %v121_v2 = vld [vmem:[%s1651_s2 + $0x2e0] sm:$0xff]  ;;  %v126_v3 = vld [vmem:[%s1651_s2 + $0x308] sm:$0xff]  ;;  %v919_v5 = vpack.c.bf16 %v352_v60, %v348_v59  ;;  %v921_v6 = vpack.c.bf16 %v361_v63, %v357_v61  ;;  %v356_v7 = vld [vmem:[%s1653_s4 + $0x110] sm:$0xff] }
  0x49   :  { %v130_v4 = vld [vmem:[%s1651_s2 + $0x328] sm:$0xff]  ;;  %v360_v8 = vld [vmem:[%s1653_s4 + $0x130] sm:$0xff]  ;;  %v365_v9 = vld [vmem:[%s1653_s4 + $0x158] sm:$0xff]  ;;  %v791_v10 = vpack.c.bf16 %v121_v2, %v117_v1 }
  0x4a   :  { %912 = vmatpush1.bf16.msra.mxu1 %v911_v44  ;;  %v369_v11 = vld [vmem:[%s1653_s4 + $0x178] sm:$0xff]  ;;  %v793_v12 = vpack.c.bf16 %v130_v4, %v126_v3  ;;  %v125_v13 = vld [vmem:[%s1651_s2 + $0x300] sm:$0xff]  ;;  %v134_v15 = vld [vmem:[%s1651_s2 + $0x348] sm:$0xff]  ;;  %v923_v17 = vpack.c.bf16 %v360_v8, %v356_v7 }
  0x4b   :  { %914 = vmatprep.subr.bf16.mxu1 %v913_v46  ;;  %784 = vmatpush1.bf16.msra.mxu0 %v783_v50  ;;  %v129_v14 = vld [vmem:[%s1651_s2 + $0x320] sm:$0xff]  ;;  %v138_v16 = vld [vmem:[%s1651_s2 + $0x368] sm:$0xff]  ;;  %v925_v18 = vpack.c.bf16 %v369_v11, %v365_v9  ;;  %v364_v19 = vld [vmem:[%s1653_s4 + $0x150] sm:$0xff] }
  0x4c   :  { %786 = vmatprep.subr.bf16.mxu0 %v785_v52  ;;  %v368_v20 = vld [vmem:[%s1653_s4 + $0x170] sm:$0xff]  ;;  %v373_v21 = vld [vmem:[%s1653_s4 + $0x198] sm:$0xff]  ;;  %v795_v22 = vpack.c.bf16 %v129_v14, %v125_v13  ;;  %v797_v24 = vpack.c.bf16 %v138_v16, %v134_v15  ;;  %v133_v25 = vld [vmem:[%s1651_s2 + $0x340] sm:$0xff] }
  0x4d   :  { %v377_v23 = vld [vmem:[%s1653_s4 + $0x1b8] sm:$0xff]  ;;  %v137_v26 = vld [vmem:[%s1651_s2 + $0x360] sm:$0xff]  ;;  %v142_v27 = vld [vmem:[%s1651_s2 + $0x388] sm:$0xff]  ;;  %v927_v29 = vpack.c.bf16 %v368_v20, %v364_v19 }
  0x4e   :  { %916 = vmatpush1.bf16.msra.mxu1 %v915_v57  ;;  %v146_v28 = vld [vmem:[%s1651_s2 + $0x3a8] sm:$0xff]  ;;  %v929_v30 = vpack.c.bf16 %v377_v23, %v373_v21  ;;  %v372_v32 = vld [vmem:[%s1653_s4 + $0x190] sm:$0xff]  ;;  %v381_v34 = vld [vmem:[%s1653_s4 + $0x1d8] sm:$0xff]  ;;  %v799_v35 = vpack.c.bf16 %v137_v26, %v133_v25 }
  0x4f   :  { %918 = vmatprep.subr.bf16.mxu1 %v917_v58  ;;  %788 = vmatpush1.bf16.msra.mxu0 %v787_v62  ;;  %v376_v33 = vld [vmem:[%s1653_s4 + $0x1b0] sm:$0xff]  ;;  %v385_v36 = vld [vmem:[%s1653_s4 + $0x1f8] sm:$0xff]  ;;  %v801_v37 = vpack.c.bf16 %v146_v28, %v142_v27  ;;  %v141_v38 = vld [vmem:[%s1651_s2 + $0x380] sm:$0xff] }
  0x50   :  { %790 = vmatprep.subr.bf16.mxu0 %v789_v0  ;;  %v145_v39 = vld [vmem:[%s1651_s2 + $0x3a0] sm:$0xff]  ;;  %v150_v40 = vld [vmem:[%s1651_s2 + $0x3c8] sm:$0xff]  ;;  %v931_v42 = vpack.c.bf16 %v376_v33, %v372_v32  ;;  %v933_v43 = vpack.c.bf16 %v385_v36, %v381_v34  ;;  %v380_v44 = vld [vmem:[%s1653_s4 + $0x1d0] sm:$0xff] }
  0x51   :  { %v154_v41 = vld [vmem:[%s1651_s2 + $0x3e8] sm:$0xff]  ;;  %v384_v46 = vld [vmem:[%s1653_s4 + $0x1f0] sm:$0xff]  ;;  %v803_v47 = vpack.c.bf16 %v145_v39, %v141_v38  ;;  %v149_v49 = vld [vmem:[%s1651_s2 + $0x3c0] sm:$0xff] }
  0x52   :  { %920 = vmatpush1.bf16.msra.mxu1 %v919_v5  ;;  %v805_v48 = vpack.c.bf16 %v154_v41, %v150_v40  ;;  %v153_v50 = vld [vmem:[%s1651_s2 + $0x3e0] sm:$0xff]  ;;  %v323_v51 = vld [vmem:[%s1653_s4 + $0x8] sm:$0xff]  ;;  %v935_v53 = vpack.c.bf16 %v384_v46, %v380_v44  ;;  %v558_v44 = vld [vmem:[%s1655_s6 + $0x10] sm:$0xff] }
  0x53   :  { %922 = vmatprep.subr.bf16.mxu1 %v921_v6  ;;  %792 = vmatpush1.bf16.msra.mxu0 %v791_v10  ;;  %v327_v52 = vld [vmem:[%s1653_s4 + $0x28] sm:$0xff]  ;;  %v807_v54 = vpack.c.bf16 %v153_v50, %v149_v49  ;;  %v322_v56 = vld [vmem:[%s1653_s4] sm:$0xff] }
  0x54   :  { %794 = vmatprep.subr.bf16.mxu0 %v793_v12  ;;  %v873_v55 = vpack.c.bf16 %v327_v52, %v323_v51  ;;  %v326_v57 = vld [vmem:[%s1653_s4 + $0x20] sm:$0xff]  ;;  %v331_v58 = vld [vmem:[%s1653_s4 + $0x48] sm:$0xff]  ;;  %v159_v51 = vlaneseq }
  0x55   :  { %v335_v59 = vld [vmem:[%s1653_s4 + $0x68] sm:$0xff]  ;;  %v321_v60 = vld [vmem:[%s1650_s1] sm:$0xff]  ;;  %v875_v61 = vpack.c.bf16 %v326_v57, %v322_v56 }
  0x56   :  { %924 = vmatpush1.bf16.msra.mxu1 %v923_v17  ;;  %v877_v62 = vpack.c.bf16 %v335_v59, %v331_v58  ;;  %v330_v63 = vld [vmem:[%s1653_s4 + $0x40] sm:$0xff]  ;;  %v339_v2 = vld [vmem:[%s1653_s4 + $0x88] sm:$0xff]  ;;  %v160_v52 = vshrl.u32 %v159_v51, 7 }
  0x57   :  { %926 = vmatprep.subr.bf16.mxu1 %v925_v18  ;;  %796 = vmatpush1.bf16.msra.mxu0 %v795_v22  ;;  %v334_v0 = vld [vmem:[%s1653_s4 + $0x60] sm:$0xff]  ;;  %v347_v6 = vld [vmem:[%s1653_s4 + $0xc8] sm:$0xff] }
  0x58   :  { %798 = vmatprep.subr.bf16.mxu0 %v797_v24  ;;  %v879_v1 = vpack.c.bf16 %v334_v0, %v330_v63  ;;  %v338_v4 = vld [vmem:[%s1653_s4 + $0x80] sm:$0xff]  ;;  %v351_v8 = vld [vmem:[%s1653_s4 + $0xe8] sm:$0xff] }
  0x59   :  { %v342_v5 = vld [vmem:[%s1653_s4 + $0xa0] sm:$0xff]  ;;  %v885_v11 = vpack.c.bf16 %v351_v8, %v347_v6  ;;  %v355_v12 = vld [vmem:[%s1653_s4 + $0x108] sm:$0xff] }
  0x5a   :  { %928 = vmatpush1.bf16.msra.mxu1 %v927_v29  ;;  %v883_v7 = vpack.c.bf16 %v342_v5, %v338_v4  ;;  %v346_v9 = vld [vmem:[%s1653_s4 + $0xc0] sm:$0xff]  ;;  %v359_v13 = vld [vmem:[%s1653_s4 + $0x128] sm:$0xff] }
  0x5b   :  { %930 = vmatprep.subr.bf16.mxu1 %v929_v30  ;;  %800 = vmatpush1.bf16.msra.mxu0 %v799_v35  ;;  %v350_v10 = vld [vmem:[%s1653_s4 + $0xe0] sm:$0xff]  ;;  %v889_v15 = vpack.c.bf16 %v359_v13, %v355_v12  ;;  %v363_v18 = vld [vmem:[%s1653_s4 + $0x148] sm:$0xff] }
  0x5c   :  { %802 = vmatprep.subr.bf16.mxu0 %v801_v37  ;;  %v887_v14 = vpack.c.bf16 %v350_v10, %v346_v9  ;;  %v354_v16 = vld [vmem:[%s1653_s4 + $0x100] sm:$0xff]  ;;  %v367_v19 = vld [vmem:[%s1653_s4 + $0x168] sm:$0xff]  ;;  %v161_v9 = vsub.s32 0, %v160_v52  ;;  %v165_v10 = vsub.s32 1, %v160_v52 }
  0x5d   :  { %v358_v17 = vld [vmem:[%s1653_s4 + $0x120] sm:$0xff]  ;;  %v893_v21 = vpack.c.bf16 %v367_v19, %v363_v18  ;;  %v371_v24 = vld [vmem:[%s1653_s4 + $0x188] sm:$0xff] }
  0x5e   :  { %932 = vmatpush1.bf16.msra.mxu1 %v931_v42  ;;  %v891_v20 = vpack.c.bf16 %v358_v17, %v354_v16  ;;  %v362_v22 = vld [vmem:[%s1653_s4 + $0x140] sm:$0xff]  ;;  %v375_v25 = vld [vmem:[%s1653_s4 + $0x1a8] sm:$0xff]  ;;  %v559_v42 = vld [vmem:[%s1655_s6 + $0x18] sm:$0xff] }
  0x5f   :  { %934 = vmatprep.subr.bf16.mxu1 %v933_v43  ;;  %804 = vmatpush1.bf16.msra.mxu0 %v803_v47  ;;  %v366_v23 = vld [vmem:[%s1653_s4 + $0x160] sm:$0xff]  ;;  %v897_v27 = vpack.c.bf16 %v375_v25, %v371_v24  ;;  %v379_v30 = vld [vmem:[%s1653_s4 + $0x1c8] sm:$0xff]  ;;  %v977_v43 = vmov 0.0|0.0  }
  0x60   :  { %806 = vmatprep.subr.bf16.mxu0 %v805_v48  ;;  %v895_v26 = vpack.c.bf16 %v366_v23, %v362_v22  ;;  %v370_v28 = vld [vmem:[%s1653_s4 + $0x180] sm:$0xff]  ;;  %v383_v32 = vld [vmem:[%s1653_s4 + $0x1e8] sm:$0xff] }
  0x61   :  { %v374_v29 = vld [vmem:[%s1653_s4 + $0x1a0] sm:$0xff]  ;;  %v901_v34 = vpack.c.bf16 %v383_v32, %v379_v30  ;;  %v557_v38 = vld [vmem:[%s1655_s6 + $0x8] sm:$0xff] }
  0x62   :  { %936 = vmatpush1.bf16.msra.mxu1 %v935_v53  ;;  %v899_v33 = vpack.c.bf16 %v374_v29, %v370_v28  ;;  %v378_v35 = vld [vmem:[%s1653_s4 + $0x1c0] sm:$0xff]  ;;  %v561_v46 = vld [vmem:[%s1655_s6 + $0x28] sm:$0xff]  ;;  %v169_v53 = vsub.s32 2, %v160_v52 }
  0x63   :  { %808 = vmatpush1.bf16.msra.mxu0 %v807_v54  ;;  %v382_v36 = vld [vmem:[%s1653_s4 + $0x1e0] sm:$0xff]  ;;  %941 = vmatprep.subr.bf16.mxu1 %v977_v43  ;;  %v942_v48 = vpack.c.bf16 %v561_v46, %v558_v44 }
  0x64   :  { %874 = vmatprep.subr.bf16.mxu0 %v873_v55  ;;  %v903_v37 = vpack.c.bf16 %v382_v36, %v378_v35  ;;  %v560_v39 = vld [vmem:[%s1655_s6 + $0x20] sm:$0xff]  ;;  %v173_v55 = vsub.s32 3, %v160_v52 }
  0x65   :  { %544 = vmatmul.mubr.f32.vlgmr.msra.gmra.mrb[2].mxu1 %v321_v60  ;;  %v556_v40 = vld [vmem:[%s1655_s6] sm:$0xff]  ;;  %v937_v41 = vpack.c.bf16 %v560_v39, %v557_v38 }
  0x66   :  { %244 = vmatmul.mubr.f32.vlgmr.msra.gmra.mrb[0].mxu0 %v1350_v31  ;;  %v343_v31 = vld [vmem:[%s1653_s4 + $0xa8] sm:$0xff]  ;;  %742 = vmatprep.mubr.msk.f32.mxu1 %vm978_vm0, %v976_v45  ;;  %v939_v47 = vpack.c.bf16 %v559_v42, %v556_v40  ;;  %v157_v54 = vld [vmem:[%s1652_s3] sm:$0xf]  ;;  %s979_s3 = smov [#allocation2]  }
  0x67   :  { %876 = vmatpush1.bf16.msra.mxu0 %v875_v61  ;;  %472 = vmatprep.mubr.f32.mxu0 %v976_v45  ;;  %v881_v3 = vpack.c.bf16 %v343_v31, %v339_v2  ;;  %v386_v56 = vld [vmem:[%s1654_s5] sm:$0xf]  ;;  %v174_v58 = vrot.slane %v157_v54, %v173_v55  ;;  %v166_v12 = vrot.slane %v157_v54, %v165_v10  ;;  %s725_s5 = sshll.u32 %s979_s3, 4  ;;  %s726_s5 = int_to_ptr.vmem [resolvable:$true] %s725_s5 }
  0x68   :  { %878 = vmatprep.subr.bf16.mxu0 %v877_v62  ;;  %943 = vmatpush3.bf16.msra.mxu1 %v942_v48  ;;  %v399_v57 = vrot.slane %v386_v56, %v169_v53  ;;  %v403_v59 = vrot.slane %v386_v56, %v173_v55  ;;  %v391_v13 = vrot.slane %v386_v56, %v161_v9  ;;  %s952_s23 = scalar_lea.vmem %s726_s5, 384  ;;  %p957_p1 = scmp.lt.s32.totalorder %s726_s5, %s726_s5 }
  0x69   :  { %p953_p0 = scmp.ne.s32.totalorder %s726_s5, %s952_s23  ;;  %p958_p2 = scmp.lt.s32.totalorder %s952_s23, %s952_s23 }
  0x6b   :  { %880 = vmatpush1.bf16.msra.mxu0 %v879_v1  ;;  %p959_p3 = por %p958_p2, %p957_p1 }
  0x6c   :  { %882 = vmatprep.subr.bf16.mxu0 %v881_v3 }
  0x6d   :  { %p960_p4 = pnand %p959_p3, %p953_p0 }
  0x6f   :  { %884 = vmatpush1.bf16.msra.mxu0 %v883_v7 }
  0x70   :  { %886 = vmatprep.subr.bf16.mxu0 %v885_v11  ;;  %v162_v11 = vrot.slane %v157_v54, %v161_v9 }
  0x73   :  { %888 = vmatpush1.bf16.msra.mxu0 %v887_v14  ;;  %v395_v14 = vrot.slane %v386_v56, %v165_v10 }
  0x74   :  { %890 = vmatprep.subr.bf16.mxu0 %v889_v15 }
  0x77   :  { %892 = vmatpush1.bf16.msra.mxu0 %v891_v20 }
  0x78   :  { %894 = vmatprep.subr.bf16.mxu0 %v893_v21 }
  0x7b   :  { %896 = vmatpush1.bf16.msra.mxu0 %v895_v26 }
  0x7c   :  { %898 = vmatprep.subr.bf16.mxu0 %v897_v27 }
  0x7f   :  { %900 = vmatpush1.bf16.msra.mxu0 %v899_v33 }
  0x80   :  { %902 = vmatprep.subr.bf16.mxu0 %v901_v34 }
  0x83   :  { %904 = vmatpush1.bf16.msra.mxu0 %v903_v37 }
  0x84   :  { %938 = vmatprep.subr.bf16.mxu0 %v937_v41 }
  0x86   :  { %473 = vmatmul.mubr.f32.vlgmr.msra.gmra.mrb[2].mxu0 %v321_v60 }
  0x87   :  { %630 = vmatprep.mubr.f32.mxu0 %v976_v45  ;;  %940 = vmatpush1.bf16.msra.mxu0 %v939_v47  ;;  %v170_v45 = vrot.slane %v157_v54, %v169_v53 }
 0x118   :  { %v316_v49 = vpop.f32.mrb[0].mxu1 }
 0x119   :  { %v318_v50 = vpop.f32.mrb[1].mxu1  ;;  %v317_v61 = vadd.f32 %v316_v49, %v170_v45 }
 0x11a   :  { %v319_v1 = vadd.f32 %v318_v50, %v174_v58 }
 0x138   :  { %v545_v60 = vpop.f32.mrb[2].mxu1 }
 0x139   :  { %v546_v62 = vadd.f32 %v545_v60, %v399_v57  ;;  %v547_v63 = vpop.f32.mrb[3].mxu1  ;;  %v245_v0 = vpop.f32.mrb[0].mxu0 }
 0x13a   :  { %v548_v2 = vadd.f32 %v547_v63, %v403_v59  ;;  %v247_v31 = vpop.f32.mrb[1].mxu0  ;;  %v246_v15 = vadd.f32 %v245_v0, %v162_v11 }
 0x13b   :  { %v709_v3 = vsub.f32 %v317_v61, %v546_v62  ;;  %v248_v16 = vadd.f32 %v247_v31, %v166_v12 }
 0x13c   :  { %v550_v4 = vsub.f32 %v548_v2, %v319_v1 }
 0x13e   :  { %v551_v5 = vmul.f32 1.442695, %v550_v4 }
 0x140   :  { %948 = vpow2.f32 %v551_v5 }
 0x14a   :  { %v949_v6 = vpop.eup %948 }
 0x14b   :  { %v553_v7 = vadd.f32 1.0, %v949_v6 }
 0x14d   :  { %950 = vrcp.f32 %v553_v7 }
 0x157   :  { %v951_v8 = vpop.eup %950 }
 0x158   :  { %733 = vmatmul.mubr.msk.f32.vlgmr.msra.gmra.mrb[4].mxu0 %vm562_vm1, %v951_v8  ;;  %743 = vmatmul.mubr.msk.f32.vlgmr.msra.gmra.mrb[4].mxu1 %vm562_vm1, %v951_v8 }
 0x159   :  { %v474_v17 = vpop.f32.mrb[2].mxu0 }
 0x15a   :  { %v475_v18 = vadd.f32 %v474_v17, %v391_v13  ;;  %v476_v19 = vpop.f32.mrb[3].mxu0 }
 0x15b   :  { %v477_v20 = vadd.f32 %v476_v19, %v395_v14 }
 0x15c   :  { %v707_v21 = vsub.f32 %v246_v15, %v475_v18 }
 0x15d   :  { %v708_v22 = vsub.f32 %v248_v16, %v477_v20 }
 0x22b   :  { %v632_v23 = vpop.f32.mrb[4].mxu0  ;;  %v703_v24 = vpop.f32.mrb[4].mxu1 }
 0x22c   :  { %v710_v25 = vmul.f32 %v707_v21, %v632_v23  ;;  %v712_v26 = vmul.f32 %v709_v3, %v703_v24  ;;  %v634_v27 = vpop.f32.mrb[5].mxu0  ;;  %v744_v28 = vpop.f32.mrb[5].mxu1 }
 0x22d   :  { %v711_v29 = vmul.f32 %v708_v22, %v634_v27 }
 0x22e   :  { %v713_v30 = vadd.f32 %v710_v25, %v475_v18  ;;  %v715_v32 = vadd.f32 %v712_v26, %v546_v62 }
 0x22f   :  { %v714_v33 = vadd.f32 %v711_v29, %v477_v20 }
 0x230   :  { %716 = vst [vmem:[#allocation2] sm:$0xff] %v713_v30  ;;  %718 = vst [vmem:[#allocation2 + $0x10] sm:$0xff] %v715_v32 }
 0x231   :  { %717 = vst [vmem:[#allocation2 + $0x8] sm:$0xff] %v714_v33 }
 0x232   :  { %963 = shalt.err (!%p960_p4)
}
 0x233   :  { %s964_s26 = scalar_lea.hbm %s1656_s7, 384 }
 0x234   :  { %p965_p5 = scmp.ne.s32.totalorder %s1656_s7, %s964_s26  ;;  %p968_p6 = scmp.lt.u32.totalorder %s964_s26, %s1656_s7 }
 0x236   :  { %p970_p7 = pnand %p968_p6, %p965_p5 }
 0x238   :  { %973 = shalt.err (!%p970_p7)
}
 0x239   :  { %728 = dma.vmem_to_hbm [thread:$0]  %s726_s5, 384, %s1656_s7, [#allocation3]  }
 0x23a   :  { %974 = dma.done.wait [#allocation3], 384  }
 0x23b   :  { %975 = vsyncadd [#allocation3], 4294966912 }
 0x23c   :  { %732 = vsyncpa [#allocation3], 1 }

</bundles_post_ra>
